<compile_context>
chip_gen: v7x
topology: tpu7x:2x2x1
jax: 0.10.0
libtpu: 0.0.40
codegen_flags: <defaults>
</compile_context>

<pallas_src>
import functools

import jax
import jax.numpy as jnp
from jax import lax
from jax.experimental import pallas as pl
from jax.experimental.pallas import tpu as pltpu


# ---------------------------------------------------------------------------
# chip traits
# ---------------------------------------------------------------------------
def _chip_traits():
    """Returns (vmem_capacity_bytes, mxu_contraction_depth) for the local TPU."""
    vmem, mxu_depth = 64 << 20, 256            # conservative default (v7x-like)
    try:
        kind = jax.devices()[0].device_kind.lower()
    except Exception:
        kind = ""
    if any(t in kind for t in ("v2", "v3", "v4", "v5")):
        vmem, mxu_depth = 128 << 20, 128       # 128-deep MXU generations (v5e etc.)
    elif "v6" in kind:
        vmem, mxu_depth = 128 << 20, 256
    elif "7" in kind:
        vmem, mxu_depth = 64 << 20, 256
    try:                                        # authoritative VMEM size if available
        vmem = int(pltpu.get_tpu_info().vmem_capacity_bytes)
    except Exception:
        pass
    return vmem, mxu_depth


# ---------------------------------------------------------------------------
# kernels
# ---------------------------------------------------------------------------
def _dense_small_h_kernel(*refs, K, pad, H, with_halo, compute_dtype):
    """Lane-dense small-H conv tile.

    x_ref    : (1, rows, 128)   each row = G = 128 // H consecutive positions
    halo_ref : (1, 1, 2, 128)   row 0 = previous dense row, row 1 = next dense row
    w_ref    : ((G+K-1)*H, 128) block-Toeplitz weight (see wrapper)
    o_ref    : (1, rows, 128)   lane-dense output rows (full-width stores)
    """
    if with_halo:
        x_ref, halo_ref, w_ref, o_ref = refs
    else:
        x_ref, w_ref, o_ref = refs

    def dot(a, b):
        return jnp.dot(a, b, preferred_element_type=jnp.float32)

    xd = x_ref[0].astype(compute_dtype)                   # (rows, 128)
    rows = xd.shape[0]
    left = pad * H                                        # left-context lanes
    right = (K - 1 - pad) * H                             # right-context lanes

    # Middle term: un-shifted dense rows against the central weight block.
    acc = dot(xd, w_ref[left:left + 128, :])

    if with_halo:
        prev_row = halo_ref[0, 0, 0:1, :].astype(compute_dtype)   # (1, 128)
        next_row = halo_ref[0, 0, 1:2, :].astype(compute_dtype)   # (1, 128)
        if left:
            up = prev_row if rows == 1 else jnp.concatenate(
                [prev_row, xd[:rows - 1, :]], axis=0)
            acc = acc + dot(up[:, 128 - left:], w_ref[0:left, :])
        if right:
            dn = next_row if rows == 1 else jnp.concatenate(
                [xd[1:, :], next_row], axis=0)
            acc = acc + dot(dn[:, :right], w_ref[left + 128:left + 128 + right, :])

    o_ref[0] = acc.astype(o_ref.dtype)                    # lane-dense store


def _standard_kernel(*refs, K, pad, H, with_halo, fuse_taps, compute_dtype):
    """General path (H >= 128, or shapes the dense path cannot express).

    x_ref    : (1, tS, H)
    halo_ref : (1, 1, K-1, H)   rows [0:pad] left halo, [pad:K-1] right halo
    w_ref    : (K*H, tN)        w_ref[k*H + ci, co] = W_torch[co, ci, k]
    o_ref    : (1, tS, tN)
    """
    if with_halo:
        x_ref, halo_ref, w_ref, o_ref = refs
    else:
        x_ref, w_ref, o_ref = refs

    x_tile = x_ref[0].astype(compute_dtype)               # (tS, H)
    tS = x_tile.shape[0]

    if with_halo:
        right = K - 1 - pad
        pieces = []
        if pad:
            pieces.append(halo_ref[0, 0, :pad, :].astype(compute_dtype))
        pieces.append(x_tile)
        if right:
            pieces.append(halo_ref[0, 0, pad:pad + right, :].astype(compute_dtype))
        slab = jnp.concatenate(pieces, axis=0)             # (tS + K - 1, H)
    else:
        slab = x_tile

    if fuse_taps and K > 1:
        # Fold the K taps into one lane-dense contraction: (tS, K*H) @ (K*H, tN).
        lhs = jnp.concatenate([slab[k:k + tS, :] for k in range(K)], axis=-1)
        acc = jnp.dot(lhs, w_ref[...], preferred_element_type=jnp.float32)
    else:
        def tap(k):
            return x_tile if k == pad else slab[k:k + tS, :]
        acc = jnp.dot(tap(0), w_ref[0:H, :], preferred_element_type=jnp.float32)
        for k in range(1, K):
            acc = acc + jnp.dot(tap(k), w_ref[k * H:(k + 1) * H, :],
                                preferred_element_type=jnp.float32)

    o_ref[0] = acc.astype(o_ref.dtype)


# ---------------------------------------------------------------------------
# wrapper
# ---------------------------------------------------------------------------
def _seq_tile(S, cap, align):
    """Pick a sequence tile <= cap; prefer an aligned divisor, else pad S up."""
    cap = max(align, (cap // align) * align)
    if S <= cap:
        return S, S
    for cand in range(cap, align - 1, -align):
        if S % cand == 0:
            return cand, S
    s_pad = ((S + cap - 1) // cap) * cap
    return cap, s_pad


@functools.partial(jax.jit, static_argnames=("kernel_size", "compute_dtype"))
def cnn_forward(x, weight, *, kernel_size, compute_dtype=jnp.bfloat16):
    """Pallas equivalent of CNN.forward.

    x      : (B, S, H)        activations
    weight : (H_out, H, K)    PyTorch Conv1d weight layout (out_ch, in_ch, k)
    returns: (B, S, H_out)    in x's dtype
    """
    B, S, H = x.shape
    H_out, H_in, K = weight.shape
    assert H_in == H and K == kernel_size
    pad = (K - 1) // 2
    # TODO(synk): even kernel_size — PyTorch returns S-1 timesteps for even K
    # with padding=(K-1)//2; this kernel keeps length S (asymmetric padding).

    out_dtype = x.dtype
    in_b = jnp.dtype(x.dtype).itemsize
    cd_b = jnp.dtype(compute_dtype).itemsize
    out_b = jnp.dtype(out_dtype).itemsize

    vmem_cap, mxu_depth = _chip_traits()
    hard_cap = (vmem_cap * 3) // 4                         # working-set budget
    limit_cap = max(32 << 20, vmem_cap - (16 << 20))       # never request > physical
    cap_s = 1024 if vmem_cap >= (96 << 20) else 512        # v5e/v6e vs v7x
    cap_n = 1024 if vmem_cap >= (96 << 20) else 512

    # Weight in matmul layout: w2[k*H + ci, co] = W[co, ci, k].
    w2 = jnp.transpose(weight, (2, 1, 0)).reshape(K * H, H_out)

    # ================== lane-dense small-H path ==============================
    G = 128 // H if (H < 128 and 128 % H == 0) else 0
    use_dense = (G > 0 and H_out == H and pad <= G and (K - 1 - pad) <= G)

    if use_dense:
        row_align = max(8, 32 // min(in_b, out_b))
        cap_rows = max(row_align, (cap_s * H // 128) // row_align * row_align)
        total_rows = -(-S // G)                            # ceil(S / G)
        if total_rows <= cap_rows:
            rows_t, n_rows = total_rows, total_rows
        else:
            rows_t = cap_rows
            for cand in range(cap_rows, 8 * row_align - 1, -row_align):
                if total_rows % cand == 0:
                    rows_t = cand
                    break
            n_rows = -(-total_rows // rows_t) * rows_t
        n_s = n_rows // rows_t
        S_pad = n_rows * G
        if S_pad != S:
            x = jnp.pad(x, ((0, 0), (0, S_pad - S), (0, 0)))
        x_dense = x.reshape(B, n_rows, 128)                # free layout reshape

        with_halo = K > 1
        operands = [x_dense]
        in_specs = [pl.BlockSpec((1, rows_t, 128), lambda b, s: (b, s, 0))]
        if with_halo:
            xr = x_dense.reshape(B, n_s, rows_t, 128)
            prev = jnp.concatenate(
                [jnp.zeros((B, 1, 1, 128), x_dense.dtype), xr[:, :-1, -1:, :]], axis=1)
            nxt = jnp.concatenate(
                [xr[:, 1:, :1, :], jnp.zeros((B, 1, 1, 128), x_dense.dtype)], axis=1)
            halo = jnp.concatenate([prev, nxt], axis=2)    # (B, n_s, 2, 128)
            operands.append(halo)
            in_specs.append(pl.BlockSpec((1, 1, 2, 128), lambda b, s: (b, s, 0, 0)))

        # Block-Toeplitz weight: one contraction emits G consecutive positions
        # of all H_out channels into 128 lane-dense output lanes.
        CR = (G + K - 1) * H
        w2c = w2.astype(compute_dtype)
        w_big = jnp.zeros((CR, 128), dtype=compute_dtype)
        for g in range(G):
            w_big = w_big.at[g * H:(g + K) * H, g * H_out:(g + 1) * H_out].set(w2c)
        operands.append(w_big)
        in_specs.append(pl.BlockSpec((CR, 128), lambda b, s: (0, 0)))

        out_spec = pl.BlockSpec((1, rows_t, 128), lambda b, s: (b, s, 0))
        out_shape = jax.ShapeDtypeStruct((B, n_rows, 128), out_dtype)

        block_bytes = (2 * rows_t * 128 * in_b
                       + (2 * 2 * 128 * in_b if with_halo else 0)
                       + 2 * CR * 128 * cd_b
                       + 2 * rows_t * 128 * out_b)
        temp_bytes = (rows_t + 2) * 128 * cd_b + rows_t * 128 * 4
        vmem_limit = int(min(max(block_bytes + temp_bytes + (8 << 20), 32 << 20),
                             limit_cap))
        flops = 2 * B * n_rows * CR * 128
        bytes_accessed = (B * n_rows * 128 * in_b + CR * 128 * cd_b
                          + B * n_rows * 128 * out_b)

        kernel = functools.partial(_dense_small_h_kernel, K=K, pad=pad, H=H,
                                   with_halo=with_halo, compute_dtype=compute_dtype)
        y = pl.pallas_call(
            kernel,
            out_shape=out_shape,
            grid_spec=pltpu.PrefetchScalarGridSpec(
                num_scalar_prefetch=0, grid=(B, n_s),
                in_specs=in_specs, out_specs=out_spec),
            compiler_params=pltpu.CompilerParams(
                dimension_semantics=("parallel", "parallel"),
                vmem_limit_bytes=vmem_limit),
            cost_estimate=pl.CostEstimate(flops=flops, transcendentals=0,
                                          bytes_accessed=bytes_accessed),
        )(*operands)
        y = y.reshape(B, S_pad, H_out)
        return y[:, :S, :] if S_pad != S else y

    # ================== general path (H >= 128, etc.) ========================
    # Output-channel tiling (keep last output dim a multiple of 128, or full).
    if H_out % 128 == 0:
        H_out_pad = H_out
    elif H_out < cap_n:
        H_out_pad = H_out                                  # single full-extent block
    else:
        H_out_pad = -(-H_out // 128) * 128                 # pad weight, slice output
    if H_out_pad % 128 == 0:
        tN = 128
        for cand in range(min(cap_n, H_out_pad), 127, -128):
            if H_out_pad % cand == 0:
                tN = cand
                break
    else:
        tN = H_out_pad
    n_n = H_out_pad // tN

    fuse_taps = (K > 1) and (H < mxu_depth)                # fill the MXU depth

    # Re-reads of x scale with n_n: halve the bytes by pre-casting f32 -> bf16.
    if n_n > 2 and in_b > cd_b:
        x = x.astype(compute_dtype)
        in_b = cd_b

    seq_align = max(8, 32 // min(in_b, out_b))
    tS, S_pad = _seq_tile(S, cap_s, seq_align)

    def _working_set(tS_, tN_, fuse_, w_bufs):
        blk = 2 * tS_ * H * in_b                           # x (double-buffered)
        if K > 1:
            blk += 2 * (K - 1) * H * in_b                  # halo
        blk += w_bufs * K * H * tN_ * cd_b                 # weight
        blk += 2 * tS_ * tN_ * out_b                       # out
        tmp = (tS_ + K - 1) * H * cd_b + tS_ * tN_ * 4
        if fuse_:
            tmp += tS_ * K * H * cd_b                      # im2col lhs
        return blk + tmp + (2 << 20)

    w_bufs = 2
    for _ in range(16):
        if _working_set(tS, tN, fuse_taps, w_bufs) <= hard_cap:
            break
        if w_bufs == 2 and K * H * tN * cd_b >= (2 << 20):
            w_bufs = 1                                     # grid-resident weight
            continue
        if tN > 128 and H_out_pad % 128 == 0:
            new_tN = 128
            for cand in range(tN - 128, 127, -128):
                if H_out_pad % cand == 0:
                    new_tN = cand
                    break
            tN = new_tN
            continue
        if tS > 2 * seq_align:
            tS, S_pad = _seq_tile(S, tS // 2, seq_align)
            continue
        if fuse_taps:
            fuse_taps = False
            continue
        break
    n_n = H_out_pad // tN

    if S_pad != S:
        x = jnp.pad(x, ((0, 0), (0, S_pad - S), (0, 0)))
    n_s = S_pad // tS

    w2c = w2.astype(compute_dtype)
    if H_out_pad != H_out:
        w2c = jnp.pad(w2c, ((0, 0), (0, H_out_pad - H_out)))

    with_halo = K > 1
    operands = [x]
    in_specs = [pl.BlockSpec((1, tS, H), lambda n, b, s: (b, s, 0))]
    if with_halo:
        xr = x.reshape(B, n_s, tS, H)
        parts = []
        if pad > 0:
            left = jnp.concatenate(
                [jnp.zeros((B, 1, pad, H), x.dtype), xr[:, :-1, tS - pad:, :]], axis=1)
            parts.append(left)
        if K - 1 - pad > 0:
            right = jnp.concatenate(
                [xr[:, 1:, :K - 1 - pad, :],
                 jnp.zeros((B, 1, K - 1 - pad, H), x.dtype)], axis=1)
            parts.append(right)
        halo = parts[0] if len(parts) == 1 else jnp.concatenate(parts, axis=2)
        operands.append(halo)
        in_specs.append(pl.BlockSpec((1, 1, K - 1, H), lambda n, b, s: (b, s, 0, 0)))

    # The weight block is constant across the whole inner (B, n_s) sweep; a 2nd
    # pipeline buffer buys nothing — single-buffer it when it is large.
    if w_bufs == 1:
        try:
            w_spec = pl.BlockSpec((K * H, tN), lambda n, b, s: (0, n),
                                  pipeline_mode=pl.Buffered(1))
        except Exception:
            w_spec = pl.BlockSpec((K * H, tN), lambda n, b, s: (0, n))
    else:
        w_spec = pl.BlockSpec((K * H, tN), lambda n, b, s: (0, n))
    operands.append(w2c)
    in_specs.append(w_spec)

    out_spec = pl.BlockSpec((1, tS, tN), lambda n, b, s: (b, s, n))
    out_shape = jax.ShapeDtypeStruct((B, S_pad, H_out_pad), out_dtype)

    ws = _working_set(tS, tN, fuse_taps, w_bufs)
    vmem_limit = int(min(max(ws + (8 << 20), 32 << 20), limit_cap))
    flops = 2 * B * S_pad * K * H * H_out_pad
    bytes_accessed = (n_n * B * S_pad * H * in_b + K * H * H_out_pad * cd_b
                      + B * S_pad * H_out_pad * out_b)

    kernel = functools.partial(_standard_kernel, K=K, pad=pad, H=H,
                               with_halo=with_halo, fuse_taps=fuse_taps,
                               compute_dtype=compute_dtype)
    y = pl.pallas_call(
        kernel,
        out_shape=out_shape,
        grid_spec=pltpu.PrefetchScalarGridSpec(
            num_scalar_prefetch=0, grid=(n_n, B, n_s),
            in_specs=in_specs, out_specs=out_spec),
        compiler_params=pltpu.CompilerParams(
            dimension_semantics=("parallel", "parallel", "parallel"),
            vmem_limit_bytes=vmem_limit),
        cost_estimate=pl.CostEstimate(flops=flops, transcendentals=0,
                                      bytes_accessed=bytes_accessed),
    )(*operands)
    if S_pad != S or H_out_pad != H_out:
        y = y[:, :S, :H_out]
    return y


# ---------------------------------------------------------------------------
# reference + demo
# ---------------------------------------------------------------------------
def _reference_forward(x, weight):
    """Pure-JAX reference matching nn.Conv1d(..., bias=False, padding=pad)."""
    x_ncl = jnp.transpose(x, (0, 2, 1))                    # (B, H, S)
    K = weight.shape[-1]
    pad = (K - 1) // 2
    y = lax.conv_general_dilated(
        x_ncl, weight,
        window_strides=(1,),
        padding=[(pad, pad)],
        dimension_numbers=("NCH", "OIH", "NCH"),
        precision=lax.Precision.HIGHEST,
    )
    return jnp.transpose(y, (0, 2, 1))


if __name__ == "__main__":
    batch, seq_len, hidden_size, kernel_size = 2, 8, 32, 3

    key = jax.random.PRNGKey(0)
    kx, kw = jax.random.split(key)

    x = jax.random.normal(kx, (batch, seq_len, hidden_size), dtype=jnp.float32)
    bound = 1.0 / (hidden_size * kernel_size) ** 0.5
    weight = jax.random.uniform(
        kw, (hidden_size, hidden_size, kernel_size),
        dtype=jnp.float32, minval=-bound, maxval=bound)

    # Round test inputs to bf16-representable values so the bf16-MXU kernel and
    # the f32 reference agree tightly (accumulation-order noise only).
    x = x.astype(jnp.bfloat16).astype(jnp.float32)
    weight = weight.astype(jnp.bfloat16).astype(jnp.float32)

    out = jax.block_until_ready(cnn_forward(x, weight, kernel_size=kernel_size))
    ref = jax.block_until_ready(_reference_forward(x, weight))

    assert out.shape == (batch, seq_len, hidden_size)
    max_err = float(jnp.max(jnp.abs(out - ref)))
    assert jnp.allclose(out, ref, atol=2e-3, rtol=2e-3), max_err

    print("KERNEL_OK")
</pallas_src>

<mosaic_0001>
module attributes {stable_mosaic.version = 11 : i64} {
  func.func @_dense_small_h_kernel(%arg0: i32, %arg1: i32, %arg2: memref<1x2x128xf32, #tpu.memory_space<vmem>>, %arg3: memref<1x1x2x128xf32, #tpu.memory_space<vmem>>, %arg4: memref<192x128xbf16, #tpu.memory_space<vmem>>, %arg5: memref<1x2x128xf32, #tpu.memory_space<vmem>>) attributes {dimension_semantics = [#tpu.dimension_semantics<parallel>, #tpu.dimension_semantics<parallel>], iteration_bounds = array<i64: 2, 1>, scalar_prefetch = 0 : i64, scratch_operands = 0 : i64, tpu.core_type = #tpu.core_type<tc>, window_params = [{transform_indices = @transform_0, window_bounds = array<i64: 1, 2, 128>}, {transform_indices = @transform_1, window_bounds = array<i64: 1, 1, 2, 128>}, {pipeline_mode = #tpu.pipeline_mode<synchronous>, transform_indices = @transform_2, window_bounds = array<i64: 192, 128>}, {transform_indices = @transform_3, window_bounds = array<i64: 1, 2, 128>}]} {
    %c0 = arith.constant 0 : index
    %c0_0 = arith.constant 0 : index
    %c0_1 = arith.constant 0 : index
    %0 = vector.load %arg2[%c0, %c0_0, %c0_1] : memref<1x2x128xf32, #tpu.memory_space<vmem>>, vector<1x2x128xf32>
    %1 = vector.shape_cast %0 : vector<1x2x128xf32> to vector<2x128xf32>
    %2 = arith.truncf %1 : vector<2x128xf32> to vector<2x128xbf16>
    %c32 = arith.constant 32 : index
    %c0_2 = arith.constant 0 : index
    %3 = vector.load %arg4[%c32, %c0_2] : memref<192x128xbf16, #tpu.memory_space<vmem>>, vector<128x128xbf16>
    %cst = arith.constant dense<0.000000e+00> : vector<2x128xf32>
    %4 = tpu.matmul %2, %3, %cst {dimension_numbers = #tpu.dot_dimension_numbers<[1], [0], [0], [1], [0, 0, 1, 1], [], []>} : vector<2x128xbf16>, vector<128x128xbf16>, vector<2x128xf32> -> vector<2x128xf32>
    %c0_3 = arith.constant 0 : index
    %c0_4 = arith.constant 0 : index
    %c0_5 = arith.constant 0 : index
    %c0_6 = arith.constant 0 : index
    %5 = vector.load %arg3[%c0_3, %c0_4, %c0_5, %c0_6] : memref<1x1x2x128xf32, #tpu.memory_space<vmem>>, vector<1x1x1x128xf32>
    %6 = vector.shape_cast %5 : vector<1x1x1x128xf32> to vector<1x128xf32>
    %7 = arith.truncf %6 : vector<1x128xf32> to vector<1x128xbf16>
    %c0_7 = arith.constant 0 : index
    %c0_8 = arith.constant 0 : index
    %c1 = arith.constant 1 : index
    %c0_9 = arith.constant 0 : index
    %8 = vector.load %arg3[%c0_7, %c0_8, %c1, %c0_9] : memref<1x1x2x128xf32, #tpu.memory_space<vmem>>, vector<1x1x1x128xf32>
    %9 = vector.shape_cast %8 : vector<1x1x1x128xf32> to vector<1x128xf32>
    %10 = arith.truncf %9 : vector<1x128xf32> to vector<1x128xbf16>
    %11 = vector.extract_strided_slice %2 {offsets = [0, 0], sizes = [1, 128], strides = [1, 1]} : vector<2x128xbf16> to vector<1x128xbf16>
    %12 = tpu.concatenate %7, %11 in 0 : vector<1x128xbf16>, vector<1x128xbf16> -> vector<2x128xbf16>
    %13 = vector.extract_strided_slice %12 {offsets = [0, 96], sizes = [2, 32], strides = [1, 1]} : vector<2x128xbf16> to vector<2x32xbf16>
    %c0_10 = arith.constant 0 : index
    %c0_11 = arith.constant 0 : index
    %14 = vector.load %arg4[%c0_10, %c0_11] : memref<192x128xbf16, #tpu.memory_space<vmem>>, vector<32x128xbf16>
    %cst_12 = arith.constant dense<0.000000e+00> : vector<2x128xf32>
    %15 = tpu.matmul %13, %14, %cst_12 {dimension_numbers = #tpu.dot_dimension_numbers<[1], [0], [0], [1], [0, 0, 1, 1], [], []>} : vector<2x32xbf16>, vector<32x128xbf16>, vector<2x128xf32> -> vector<2x128xf32>
    %16 = arith.addf %4, %15 : vector<2x128xf32>
    %17 = vector.extract_strided_slice %2 {offsets = [1, 0], sizes = [1, 128], strides = [1, 1]} : vector<2x128xbf16> to vector<1x128xbf16>
    %18 = tpu.concatenate %17, %10 in 0 : vector<1x128xbf16>, vector<1x128xbf16> -> vector<2x128xbf16>
    %19 = vector.extract_strided_slice %18 {offsets = [0, 0], sizes = [2, 32], strides = [1, 1]} : vector<2x128xbf16> to vector<2x32xbf16>
    %c160 = arith.constant 160 : index
    %c0_13 = arith.constant 0 : index
    %20 = vector.load %arg4[%c160, %c0_13] : memref<192x128xbf16, #tpu.memory_space<vmem>>, vector<32x128xbf16>
    %cst_14 = arith.constant dense<0.000000e+00> : vector<2x128xf32>
    %21 = tpu.matmul %19, %20, %cst_14 {dimension_numbers = #tpu.dot_dimension_numbers<[1], [0], [0], [1], [0, 0, 1, 1], [], []>} : vector<2x32xbf16>, vector<32x128xbf16>, vector<2x128xf32> -> vector<2x128xf32>
    %22 = arith.addf %16, %21 : vector<2x128xf32>
    %c0_15 = arith.constant 0 : index
    %c0_16 = arith.constant 0 : index
    %c0_17 = arith.constant 0 : index
    %23 = vector.load %arg5[%c0_15, %c0_16, %c0_17] : memref<1x2x128xf32, #tpu.memory_space<vmem>>, vector<1x2x128xf32>
    %24 = vector.shape_cast %23 : vector<1x2x128xf32> to vector<2x128xf32>
    %25 = vector.shape_cast %22 : vector<2x128xf32> to vector<1x2x128xf32>
    tpu.vector_store %arg5[%c0_15, %c0_16, %c0_17], %25 {strides = array<i32>} : memref<1x2x128xf32, #tpu.memory_space<vmem>>, vector<1x2x128xf32>,
    return
  }
  func.func @transform_0(%arg0: i32, %arg1: i32) -> (i32, i32, i32) {
    %c0_i32 = arith.constant 0 : i32
    %c0_i32_0 = arith.constant 0 : i32
    return %arg0, %arg1, %c0_i32 : i32, i32, i32
  }
  func.func @transform_1(%arg0: i32, %arg1: i32) -> (i32, i32, i32, i32) {
    %c0_i32 = arith.constant 0 : i32
    %c0_i32_0 = arith.constant 0 : i32
    %c0_i32_1 = arith.constant 0 : i32
    return %arg0, %arg1, %c0_i32, %c0_i32_0 : i32, i32, i32, i32
  }
  func.func @transform_2(%arg0: i32, %arg1: i32) -> (i32, i32) {
    %c0_i32 = arith.constant 0 : i32
    %c0_i32_0 = arith.constant 0 : i32
    %c0_i32_1 = arith.constant 0 : i32
    return %c0_i32, %c0_i32_0 : i32, i32
  }
  func.func @transform_3(%arg0: i32, %arg1: i32) -> (i32, i32, i32) {
    %c0_i32 = arith.constant 0 : i32
    %c0_i32_0 = arith.constant 0 : i32
    return %arg0, %arg1, %c0_i32 : i32, i32, i32
  }
}

</mosaic_0001>

<bundles_post_ra>
// kernel: cnn_forward.1
= control target key start
LH: loop header
LB: loop body
LE: loop exit
PB: predicated region body
PF: predicated region fallthrough
CT: control target
= control target key end

     0   :  { %s728_s12 = smov 0   ;;  %s730_s13 = smov 0   ;;  %s809_s0 = inlined_call_operand.vmem [shape: f32[2,2,128], index: 0, kind: input, shape index: {}]   ;;  %s810_s1 = inlined_call_operand.vmem [shape: f32[2,1,2,128], index: 1, kind: input, shape index: {}]   ;;  %s811_s2 = inlined_call_operand.vmem [shape: bf16[192,128], index: 2, kind: input, shape index: {}]   ;;  %s812_s3 = inlined_call_operand.vmem [shape: f32[2,2,128], index: 3, kind: output, shape index: {}]  }
   0x1   :  { %s732_s14 = smov 0  }
   0x2 LB: > { %s25_s15 = sadd.s32 1, %s699_s13  ;;  %p569_p0 = scmp.ge.s32.totalorder %s703_s14, 1  ;;  %s703_s14 = sphi %s732_s14, %s13_s14   ;;  %s699_s13 = sphi %s730_s13, %s814_s13   ;;  %s695_s12 = sphi %s728_s12, %s813_s12  }
   0x3   : > { %p27_p1 = scmp.ge.s32.totalorder %s25_s15, 2  ;;  %p169_p2 = scmp.lt.s32.totalorder %s703_s14, 3 }
   0x5   : > { %s816_s15 = smov (%p27_p1, %s25_s15), 0  ;;  %p170_p3 = pnand %p569_p0, %p169_p2 }
   0x6   : > { %p204_p4 = scmp.lt.s32.totalorder (!%p170_p3), %s695_s12, 1  ;;  %vm252_vm0 = vcmask (!%p170_p3), 1040384   ;;  %v705_v0 = vmov (!%p170_p3), 0.0   ;;  %v669_v1 = vld [vmem:[%s811_s2 + $0x10] sm:$0xff] (!%p170_p3)   ;;  %vm706_vm1 = vmmov (!%p170_p3), 0   ;;  %v670_v2 = vld [vmem:[%s811_s2 + $0x18] sm:$0xff] (!%p170_p3)  }
   0x7   : > { %173 = sbr.rel (%p170_p3) target bundleno = 361 (0x169), region = 32  ;;  %612 = vmatprep.subr.bf16.mxu1 (!%p170_p3), %v705_v0  ;;  %604 = vmatprep.subr.bf16.mxu0 (!%p170_p3), %v705_v0  ;;  %vm253_vm2 = vsmask.f32 (!%p170_p3), 256  ;;  %v671_v9 = vld [vmem:[%s811_s2 + $0x20] sm:$0xff] (!%p170_p3)   ;;  %v677_v16 = vld [vmem:[%s811_s2 + $0x8] sm:$0xff] (!%p170_p3)   ;;  %s707_s6 = smov (!%p170_p3), 32  }
   0x8   : > { %608 = vmatprep.mubr.msk.bf16.mxu0 (!%p170_p3), %vm706_vm1, %v705_v0  ;;  %628 = vmatprep.mubr.msk.bf16.mxu1 (!%p170_p3), %vm706_vm1, %v705_v0  ;;  %vm254_vm3 = vmand (!%p170_p3), %vm252_vm0, %vm253_vm2  ;;  %v675_v13 = vld [vmem:[%s811_s2] sm:$0xff] (!%p170_p3)   ;;  %v672_v17 = vld [vmem:[%s811_s2 + $0x28] sm:$0xff] (!%p170_p3)   ;;  %vm275_vm4 = vcmask (!%p170_p3), 261120  }
   0x9   : > { %613 = vmatpush3.bf16.msra.mxu1 (!%p170_p3), %v669_v1  ;;  %605 = vmatpush3.bf16.msra.mxu0 (!%p170_p3), %v675_v13  ;;  %v673_v18 = vld [vmem:[%s811_s2 + $0x30] sm:$0xff] (!%p170_p3)   ;;  %v674_v19 = vld [vmem:[%s811_s2 + $0x38] sm:$0xff] (!%p170_p3)   ;;  %v676_v20 = vld [vmem:[%s811_s2 + $0x40] sm:$0xff] (!%p170_p3)  }
   0xa   : > { %614 = vmatprep.subr.bf16.mxu1 (!%p170_p3), %v705_v0  ;;  %606 = vmatprep.subr.bf16.mxu0 (!%p170_p3), %v705_v0  ;;  %v678_v21 = vld [vmem:[%s811_s2 + $0x48] sm:$0xff] (!%p170_p3)   ;;  %v679_v22 = vld [vmem:[%s811_s2 + $0x50] sm:$0xff] (!%p170_p3)   ;;  %v680_v24 = vld [vmem:[%s811_s2 + $0x58] sm:$0xff] (!%p170_p3)  }
   0xd   : > { %615 = vmatpush3.bf16.msra.mxu1 (!%p170_p3), %v670_v2  ;;  %607 = vmatpush3.bf16.msra.mxu0 (!%p170_p3), %v677_v16 }
   0xe   : > { %s818_s12 = smov (!%p204_p4, %s695_s12), 1  ;;  %616 = vmatprep.subr.bf16.mxu1 %v705_v0  ;;  %632 = vmatprep.subr.bf16.mxu0 %v705_v0 }
   0xf   : > { %s751_s18 = sshll.u32 %s818_s12, 1 }
  0x10   : > { %s210_s23 = scalar_lea.vmem %s809_s0, %s751_s18  ;;  %s217_s26 = scalar_lea.vmem %s810_s1, %s751_s18 }
  0x11   : > { %v226_v3 = vld [vmem:[%s210_s23] sm:$0x3]  ;;  %617 = vmatpush3.bf16.msra.mxu1 %v671_v9  ;;  %s224_s27 = scalar_lea.vmem %s812_s3, %s751_s18 }
  0x12   : > { %v244_v4 = vld [vmem:[%s217_s26] sm:$0x1]  ;;  %v246_v5 = vld [vmem:[%s217_s26 + $0x1] sm:$0x1]  ;;  %v227_v6 = vpack.c.bf16 %v226_v3, %v226_v3  ;;  %618 = vmatprep.subr.bf16.mxu1 %v705_v0 }
  0x13   : > { %v245_v7 = vpack.c.bf16 %v244_v4, %v244_v4  ;;  %v247_v8 = vpack.c.bf16 %v246_v5, %v246_v5 }
  0x14   : > { %v249_v10 = vshll.u32 %v227_v6, 16  ;;  %v407_v11 = vshrl.u32 %v227_v6, 16 }
  0x15   : > { %v411_v12 = vshll.u32 %v247_v8, 16  ;;  %619 = vmatpush3.bf16.msra.mxu1 %v672_v17 }
  0x16   : > { %v255_v14 = vsel %vm254_vm3, %v245_v7, %v249_v10  ;;  %620 = vmatprep.subr.bf16.mxu1 %v705_v0 }
  0x17   : > { %v414_v15 = vsel %vm254_vm3, %v407_v11, %v411_v12  ;;  %261 = vrot.lane.b32.xlu0 %v255_v14, %s707_s6 }
  0x19   : > { %621 = vmatpush3.bf16.msra.mxu1 %v673_v18 }
  0x1a   : > { %622 = vmatprep.subr.bf16.mxu1 %v705_v0 }
  0x1d   : > { %623 = vmatpush3.bf16.msra.mxu1 %v674_v19 }
  0x1e   : > { %624 = vmatprep.subr.bf16.mxu1 %v705_v0 }
  0x21   : > { %625 = vmatpush3.bf16.msra.mxu1 %v676_v20 }
  0x22   : > { %626 = vmatprep.subr.bf16.mxu1 %v705_v0 }
  0x25   : > { %627 = vmatpush3.bf16.msra.mxu1 %v678_v21 }
  0x28   : > { %629 = vmatmul.mubr.bf16.vlgmr.msra.gmra.mrb[0].mxu1 %v227_v6 }
  0x89   : > { %v262_v23 = vpop.permute.xlu0 %261 }
  0x8a   : > { %609 = vmatmul.mubr.msk.bf16.vlgmr.msra.gmra.mrb[0].mxu0 %vm275_vm4, %v262_v23 }
  0x8b   : > { %633 = vmatpush3.bf16.msra.mxu0 %v679_v22  ;;  %636 = vmatprep.mubr.msk.bf16.mxu0 %vm706_vm1, %v705_v0 }
  0x8c   : > { %634 = vmatprep.subr.bf16.mxu0 %v705_v0 }
  0x8f   : > { %635 = vmatpush3.bf16.msra.mxu0 %v680_v24 }
  0x92   : > { %637 = vmatmul.mubr.msk.bf16.vlgmr.msra.gmra.mrb[4].mxu0 %vm275_vm4, %v414_v15 }
  0xfb   : > { %v401_v25 = vpop.f32.mrb[0].mxu1 }
  0xfc   : > { %v630_v26 = vpop.f32.mrb[1].mxu1 }
  0xfd   : > { %v404_v27 = vpop.f32.mrb[2].mxu1 }
  0xfe   : > { %v631_v28 = vpop.f32.mrb[3].mxu1 }
 0x15d   : > { %v313_v29 = vpop.f32.mrb[0].mxu0 }
 0x15e   : > { %v402_v30 = vadd.f32 %v401_v25, %v313_v29  ;;  %v610_v31 = vpop.f32.mrb[1].mxu0 }
 0x15f   : > { %v316_v32 = vpop.f32.mrb[2].mxu0 }
 0x160   : > { %v611_v33 = vpop.f32.mrb[3].mxu0 }
 0x165   : > { %v468_v34 = vpop.f32.mrb[4].mxu0 }
 0x166   : > { %v474_v35 = vadd.f32 %v468_v34, %v402_v30  ;;  %v638_v36 = vpop.f32.mrb[5].mxu0 }
 0x167   : > { %v471_v37 = vpop.f32.mrb[6].mxu0 }
 0x168   : > { %475 = vst [vmem:[%s224_s27] sm:$0x3] %v474_v35  ;;  %v639_v38 = vpop.f32.mrb[7].mxu0 }
 0x169 PF: > { %s13_s14 = sadd.s32 1, %s703_s14   ;;  %s813_s12 = smov %s699_s13 }
 0x16a   : > { %p10_p5 = scmp.ge.s32.totalorder %s13_s14, 4   ;;  %s814_s13 = smov %s816_s15 }
 0x16c   :  { %12 = sbr.rel (!%p10_p5) target bundleno = 2 (0x2), region = 65 }

</bundles_post_ra>
